<compile_context>
chip_gen: v7x
topology: tpu7x:2x2x1
jax: 0.10.0
libtpu: 0.0.40
codegen_flags: <defaults>
</compile_context>

<pallas_src>
import functools

import jax
import jax.numpy as jnp
from jax.experimental import pallas as pl
from jax.experimental.pallas import tpu as pltpu


def _round_up(x, m):
    return (x + m - 1) // m * m


# -----------------------------------------------------------------------------
# Pass 1: per-feature raw moments + SimCLR CE sum, accumulated over batch tiles.
# Output slab rows: 0: sum_a  1: sum_a^2  2: sum_b  3: sum_b^2
#                   4: [sum_n CE_n, 0, ...]   5-7: zero
# -----------------------------------------------------------------------------
def _stats_simclr_kernel(za_ref, zb_ref, logits_ref, out_ref, *, n_true, inv_temp):
    g = pl.program_id(0)
    k = pl.program_id(1)
    steps = pl.num_programs(1)
    tn1, dp = za_ref.shape

    za = za_ref[...].astype(jnp.float32)          # (tn1, Dp); padded entries are 0
    zb = zb_ref[...].astype(jnp.float32)

    sum_a = jnp.sum(za, axis=0, keepdims=True)
    sumsq_a = jnp.sum(za * za, axis=0, keepdims=True)
    sum_b = jnp.sum(zb, axis=0, keepdims=True)
    sumsq_b = jnp.sum(zb * zb, axis=0, keepdims=True)

    # SimCLR CE with label 0: logsumexp(logits/T) - logits[:,0]/T (mask padded rows)
    logits = logits_ref[...].astype(jnp.float32) * inv_temp        # (tn1, Kp)
    m = jnp.max(logits, axis=1, keepdims=True)
    lse = jnp.log(jnp.sum(jnp.exp(logits - m), axis=1, keepdims=True)) + m
    ce = lse - logits[:, 0:1]                                       # (tn1, 1)
    row = (g * steps + k) * tn1 + jax.lax.broadcasted_iota(jnp.int32, (tn1, 1), 0)
    ce = jnp.where(row < n_true, ce, 0.0)
    ce_sum = jnp.sum(ce)

    lane = jax.lax.broadcasted_iota(jnp.int32, (1, dp), 1)
    ce_row = jnp.where(lane == 0, ce_sum, 0.0)
    zero_row = jnp.zeros((1, dp), jnp.float32)
    block = jnp.concatenate(
        [sum_a, sumsq_a, sum_b, sumsq_b, ce_row, zero_row, zero_row, zero_row],
        axis=0)

    @pl.when(k == 0)
    def _():
        out_ref[...] = jnp.zeros_like(out_ref)

    out_ref[...] += block


# -----------------------------------------------------------------------------
# Pass 2: tiled raw cross-moment + rank-1 BN correction in the epilogue.
# Per (i, j) tile emits: [0,0] = off-diagonal sum(c^2), [0,1] = sum((diag-1)^2).
# -----------------------------------------------------------------------------
def _corr_kernel(stats_ref, stats_t_ref, zat_ref, zb_ref, out_ref, acc_ref, *,
                 n_true, d_true, td):
    i = pl.program_id(0)
    j = pl.program_id(1)
    k = pl.program_id(2)

    @pl.when(k == 0)
    def _():
        acc_ref[...] = jnp.zeros_like(acc_ref)

    # Raw cross-moment: pure DMA + MXU inner loop (padded batch rows are zero).
    acc_ref[...] += jnp.dot(zat_ref[...], zb_ref[...],
                            preferred_element_type=jnp.float32)

    @pl.when(k == pl.num_programs(2) - 1)
    def _():
        inv_n = 1.0 / n_true
        col0 = pl.multiple_of(j * td, 128)
        row0 = pl.multiple_of(i * td, 8)
        mean_b = stats_ref[2:3, pl.ds(col0, td)]        # (1, td)
        istd_b = stats_ref[3:4, pl.ds(col0, td)]        # (1, td)
        mean_a = stats_t_ref[pl.ds(row0, td), 0:1]      # (td, 1)
        istd_a = stats_t_ref[pl.ds(row0, td), 1:2]      # (td, 1)

        # c = (istd_a ⊗ istd_b) * (M/N - mean_a ⊗ mean_b); padded features give 0.
        c_blk = (acc_ref[...] * inv_n - mean_a * mean_b) * (istd_a * istd_b)
        total_sq = jnp.sum(c_blk * c_blk)

        r = jax.lax.broadcasted_iota(jnp.int32, (td, td), 0)
        cc = jax.lax.broadcasted_iota(jnp.int32, (td, td), 1)
        diag_mask = (r == cc) & ((i * td + r) < d_true) & (i == j)
        diag_c = jnp.where(diag_mask, c_blk, 0.0)
        on_partial = jnp.sum(jnp.where(diag_mask, (c_blk - 1.0) ** 2, 0.0))
        off_partial = total_sq - jnp.sum(diag_c * diag_c)

        rr = jax.lax.broadcasted_iota(jnp.int32, (8, 128), 0)
        ll = jax.lax.broadcasted_iota(jnp.int32, (8, 128), 1)
        out_ref[...] = jnp.where(
            (rr == 0) & (ll == 0), off_partial,
            jnp.where((rr == 0) & (ll == 1), on_partial, 0.0))


@functools.partial(jax.jit,
                   static_argnames=("lambd", "temperature", "bt_coe", "eps"))
def bt_simclr_head(z_a, z_b, pos, neg, *, lambd=0.0051, temperature=0.1,
                   bt_coe=1.0, eps=1e-5):
    """Pallas equivalent of BtSimClrHead.forward; returns {'loss': scalar}."""
    N, D = z_a.shape
    K = neg.shape[1]
    base = 16 if z_a.dtype == jnp.bfloat16 else 8   # bf16 needs (16,128) min tile

    # ---- feature tiling ------------------------------------------------------
    d_pad = _round_up(D, 128)
    if d_pad <= 1024:
        td = d_pad
    else:
        td = 1024
        while td > 128 and d_pad % td != 0:
            td //= 2
    gi = d_pad // td

    # ---- batch tiling --------------------------------------------------------
    tn2 = min(256, _round_up(N, base))              # MXU contraction (N) tile
    n_pad = _round_up(N, tn2)
    kp = _round_up(K + 1, 128)                      # [pos | neg] padded lane width

    # pass-1 batch tile: grow toward ~8 MiB of per-step input (za+zb+logits) so
    # per-step overhead is amortized; shrink (divisor of tn2) only for huge D.
    per_row_bytes = (2 * d_pad + kp) * 4
    cap = 8 << 20
    tn1 = tn2
    while (tn1 * 2) <= n_pad and n_pad % (tn1 * 2) == 0 and (tn1 * 2) * per_row_bytes <= cap:
        tn1 *= 2
    while tn1 > base and tn1 * per_row_bytes > cap:
        half = tn1 // 2
        if half >= base and half % base == 0 and tn2 % half == 0:
            tn1 = half
        else:
            break

    steps_total = n_pad // tn1
    G = 2 if (steps_total >= 2 and steps_total % 2 == 0) else 1   # v7x megacore split
    steps = steps_total // G

    # ---- padding (zeros for z; very negative for padded logit entries) -------
    za_p = jnp.pad(z_a, ((0, n_pad - N), (0, d_pad - D)))
    zb_p = jnp.pad(z_b, ((0, n_pad - N), (0, d_pad - D)))
    zat_p = za_p.T                                   # (d_pad, n_pad) MXU-native LHS
    logits = jnp.concatenate([pos, neg], axis=1)     # (N, 1+K)
    logits_p = jnp.pad(logits, ((0, n_pad - N), (0, kp - (K + 1))),
                       constant_values=-1e9)

    # ---- pass 1: raw moments + SimCLR CE sum ----------------------------------
    stats_raw = pl.pallas_call(
        functools.partial(_stats_simclr_kernel, n_true=N,
                          inv_temp=1.0 / float(temperature)),
        grid=(G, steps),
        in_specs=[
            pl.BlockSpec((tn1, d_pad), lambda g, k: (g * steps + k, 0)),
            pl.BlockSpec((tn1, d_pad), lambda g, k: (g * steps + k, 0)),
            pl.BlockSpec((tn1, kp), lambda g, k: (g * steps + k, 0)),
        ],
        out_specs=pl.BlockSpec((None, 8, d_pad), lambda g, k: (g, 0, 0)),
        out_shape=jax.ShapeDtypeStruct((G, 8, d_pad), jnp.float32),
        compiler_params=pltpu.CompilerParams(
            dimension_semantics=("parallel", "arbitrary"),
            vmem_limit_bytes=32 << 20),
    )(za_p, zb_p, logits_p)

    # ---- O(D) finalize in XLA: BN stats from single-pass moments --------------
    moments = jnp.sum(stats_raw, axis=0)             # (8, d_pad)
    inv_n = 1.0 / N
    mean_a = moments[0] * inv_n
    mean_b = moments[2] * inv_n
    var_a = jnp.maximum(moments[1] * inv_n - mean_a * mean_a, 0.0)
    var_b = jnp.maximum(moments[3] * inv_n - mean_b * mean_b, 0.0)
    istd_a = jax.lax.rsqrt(var_a + eps)
    istd_b = jax.lax.rsqrt(var_b + eps)
    ce_sum = moments[4, 0]

    zeros_d = jnp.zeros_like(mean_a)
    stats = jnp.stack([mean_a, istd_a, mean_b, istd_b,
                       zeros_d, zeros_d, zeros_d, zeros_d], axis=0)   # (8, d_pad)
    stats = stats.astype(jnp.float32)
    stats_t = stats.T                                                  # (d_pad, 8)

    # ---- pass 2: MXU-tiled raw moment + rank-1 BN correction ------------------
    gk = n_pad // tn2
    partials = pl.pallas_call(
        functools.partial(_corr_kernel, n_true=N, d_true=D, td=td),
        grid=(gi, gi, gk),
        in_specs=[
            pl.BlockSpec((8, d_pad), lambda i, j, k: (0, 0)),     # stats (lane layout)
            pl.BlockSpec((d_pad, 8), lambda i, j, k: (0, 0)),     # stats^T (sublane)
            pl.BlockSpec((td, tn2), lambda i, j, k: (i, k)),      # z_a^T tile
            pl.BlockSpec((tn2, td), lambda i, j, k: (k, j)),      # z_b tile
        ],
        out_specs=pl.BlockSpec((None, None, 8, 128), lambda i, j, k: (i, j, 0, 0)),
        out_shape=jax.ShapeDtypeStruct((gi, gi, 8, 128), jnp.float32),
        scratch_shapes=[pltpu.VMEM((td, td), jnp.float32)],
        compiler_params=pltpu.CompilerParams(
            dimension_semantics=("parallel", "parallel", "arbitrary"),
            vmem_limit_bytes=32 << 20),
    )(stats, stats_t, zat_p, zb_p)

    # ---- scalar glue -----------------------------------------------------------
    off_diag = jnp.sum(partials[:, :, 0, 0])
    on_diag = jnp.sum(partials[:, :, 0, 1])
    bt_loss = on_diag + lambd * off_diag
    simclr_loss = ce_sum / N
    loss = bt_coe * bt_loss + simclr_loss
    return {"loss": loss}


def _reference_loss(z_a, z_b, pos, neg, *, lambd=0.0051, temperature=0.1,
                    bt_coe=1.0, eps=1e-5):
    """Pure-JAX reference of BtSimClrHead.forward (single device)."""
    N, D = z_a.shape

    def bn(x):
        mu = jnp.mean(x, axis=0)
        var = jnp.mean((x - mu) ** 2, axis=0)
        return (x - mu) / jnp.sqrt(var + eps)

    c = bn(z_a).T @ bn(z_b) / N
    diag = jnp.diag(c)
    on_diag = jnp.sum((diag - 1.0) ** 2)
    off_diag = jnp.sum(c * c) - jnp.sum(diag * diag)
    bt_loss = on_diag + lambd * off_diag
    logits = jnp.concatenate([pos, neg], axis=1) / temperature
    lse = jax.scipy.special.logsumexp(logits, axis=1)
    simclr = jnp.mean(lse - logits[:, 0])
    return bt_coe * bt_loss + simclr


if __name__ == "__main__":
    # Small shapes consistent with BtSimClrHead.forward:
    #   z_a, z_b: (N, D); pos: (N, 1); neg: (N, K)
    N, D, K = 8, 32, 16
    key = jax.random.PRNGKey(0)
    k1, k2, k3, k4 = jax.random.split(key, 4)
    z_a = jax.random.normal(k1, (N, D), dtype=jnp.float32)
    z_b = jax.random.normal(k2, (N, D), dtype=jnp.float32)
    pos = jax.random.normal(k3, (N, 1), dtype=jnp.float32)
    neg = jax.random.normal(k4, (N, K), dtype=jnp.float32)

    losses = bt_simclr_head(z_a, z_b, pos, neg)
    loss = jax.block_until_ready(losses["loss"])

    ref = jax.block_until_ready(_reference_loss(z_a, z_b, pos, neg))
    if not bool(jnp.isfinite(loss)) or abs(float(loss) - float(ref)) > 1e-2 * (1.0 + abs(float(ref))):
        raise AssertionError(f"mismatch: kernel={float(loss)} ref={float(ref)}")

    print("KERNEL_OK")
</pallas_src>

<mosaic_0001>
module attributes {stable_mosaic.version = 11 : i64} {
  func.func @_stats_simclr_kernel(%arg0: i32, %arg1: i32, %arg2: memref<8x128xf32, #tpu.memory_space<vmem>>, %arg3: memref<8x128xf32, #tpu.memory_space<vmem>>, %arg4: memref<8x128xf32, #tpu.memory_space<vmem>>, %arg5: memref<1x8x128xf32, #tpu.memory_space<vmem>>) attributes {dimension_semantics = [#tpu.dimension_semantics<parallel>, #tpu.dimension_semantics<arbitrary>], iteration_bounds = array<i64: 1, 1>, scalar_prefetch = 0 : i64, scratch_operands = 0 : i64, tpu.core_type = #tpu.core_type<tc>, window_params = [{transform_indices = @transform_0, window_bounds = array<i64: 8, 128>}, {transform_indices = @transform_1, window_bounds = array<i64: 8, 128>}, {transform_indices = @transform_2, window_bounds = array<i64: 8, 128>}, {transform_indices = @transform_3, window_bounds = array<i64: 1, 8, 128>}]} {
    %c0 = arith.constant 0 : index
    %c0_0 = arith.constant 0 : index
    %0 = vector.load %arg2[%c0, %c0_0] : memref<8x128xf32, #tpu.memory_space<vmem>>, vector<8x128xf32>
    %c0_1 = arith.constant 0 : index
    %c0_2 = arith.constant 0 : index
    %1 = vector.load %arg3[%c0_1, %c0_2] : memref<8x128xf32, #tpu.memory_space<vmem>>, vector<8x128xf32>
    %cst = arith.constant dense<0.000000e+00> : vector<128xf32>
    %2 = vector.multi_reduction <add>, %0, %cst [0] : vector<8x128xf32> to vector<128xf32>
    %3 = vector.shape_cast %2 : vector<128xf32> to vector<1x128xf32>
    %4 = arith.mulf %0, %0 : vector<8x128xf32>
    %cst_3 = arith.constant dense<0.000000e+00> : vector<128xf32>
    %5 = vector.multi_reduction <add>, %4, %cst_3 [0] : vector<8x128xf32> to vector<128xf32>
    %6 = vector.shape_cast %5 : vector<128xf32> to vector<1x128xf32>
    %cst_4 = arith.constant dense<0.000000e+00> : vector<128xf32>
    %7 = vector.multi_reduction <add>, %1, %cst_4 [0] : vector<8x128xf32> to vector<128xf32>
    %8 = vector.shape_cast %7 : vector<128xf32> to vector<1x128xf32>
    %9 = arith.mulf %1, %1 : vector<8x128xf32>
    %cst_5 = arith.constant dense<0.000000e+00> : vector<128xf32>
    %10 = vector.multi_reduction <add>, %9, %cst_5 [0] : vector<8x128xf32> to vector<128xf32>
    %11 = vector.shape_cast %10 : vector<128xf32> to vector<1x128xf32>
    %c0_6 = arith.constant 0 : index
    %c0_7 = arith.constant 0 : index
    %12 = vector.load %arg4[%c0_6, %c0_7] : memref<8x128xf32, #tpu.memory_space<vmem>>, vector<8x128xf32>
    %cst_8 = arith.constant 1.000000e+01 : f32
    %13 = vector.broadcast %cst_8 : f32 to vector<8x128xf32>
    %14 = arith.mulf %12, %13 : vector<8x128xf32>
    %cst_9 = arith.constant dense<0xFF800000> : vector<8xf32>
    %15 = vector.multi_reduction <maximumf>, %14, %cst_9 [1] : vector<8x128xf32> to vector<8xf32>
    %16 = vector.shape_cast %15 : vector<8xf32> to vector<8x1xf32>
    %17 = vector.broadcast %16 : vector<8x1xf32> to vector<8x128xf32>
    %18 = arith.subf %14, %17 : vector<8x128xf32>
    %19 = math.exp %18 : vector<8x128xf32>
    %cst_10 = arith.constant dense<0.000000e+00> : vector<8xf32>
    %20 = vector.multi_reduction <add>, %19, %cst_10 [1] : vector<8x128xf32> to vector<8xf32>
    %21 = vector.shape_cast %20 : vector<8xf32> to vector<8x1xf32>
    %22 = math.log %21 : vector<8x1xf32>
    %23 = arith.addf %22, %16 : vector<8x1xf32>
    %24 = vector.extract_strided_slice %14 {offsets = [0, 0], sizes = [8, 1], strides = [1, 1]} : vector<8x128xf32> to vector<8x1xf32>
    %25 = arith.subf %23, %24 : vector<8x1xf32>
    %c1_i32 = arith.constant 1 : i32
    %26 = arith.muli %arg0, %c1_i32 : i32
    %27 = arith.addi %26, %arg1 : i32
    %c8_i32 = arith.constant 8 : i32
    %28 = arith.muli %27, %c8_i32 : i32
    %29 = tpu.iota {dimensions = array<i32: 0>} : vector<8x1xi32>
    %30 = vector.broadcast %28 : i32 to vector<8x1xi32>
    %31 = arith.addi %30, %29 : vector<8x1xi32>
    %c8_i32_11 = arith.constant 8 : i32
    %32 = vector.broadcast %c8_i32_11 : i32 to vector<8x1xi32>
    %33 = arith.cmpi slt, %31, %32 : vector<8x1xi32>
    %cst_12 = arith.constant 0.000000e+00 : f32
    %34 = vector.broadcast %cst_12 : f32 to vector<8x1xf32>
    %35 = arith.select %33, %25, %34 : vector<8x1xi1>, vector<8x1xf32>
    %36 = vector.shape_cast %35 : vector<8x1xf32> to vector<1x8x1xf32>
    %cst_13 = arith.constant dense<0.000000e+00> : vector<1xf32>
    %37 = vector.multi_reduction <add>, %36, %cst_13 [1, 2] : vector<1x8x1xf32> to vector<1xf32>
    %38 = vector.shape_cast %37 : vector<1xf32> to vector<1x1x1xf32>
    %39 = vector.extract %38[0, 0, 0] : f32 from vector<1x1x1xf32>
    %40 = tpu.iota {dimensions = array<i32: 1>} : vector<1x128xi32>
    %c0_i32 = arith.constant 0 : i32
    %41 = vector.broadcast %c0_i32 : i32 to vector<1x128xi32>
    %42 = arith.cmpi eq, %40, %41 : vector<1x128xi32>
    %cst_14 = arith.constant 0.000000e+00 : f32
    %43 = vector.broadcast %39 : f32 to vector<1x128xf32>
    %44 = vector.broadcast %cst_14 : f32 to vector<1x128xf32>
    %45 = arith.select %42, %43, %44 : vector<1x128xi1>, vector<1x128xf32>
    %cst_15 = arith.constant 0.000000e+00 : f32
    %46 = vector.broadcast %cst_15 : f32 to vector<1x128xf32>
    %47 = tpu.concatenate %3, %6, %8, %11, %45, %46, %46, %46 in 0 : vector<1x128xf32>, vector<1x128xf32>, vector<1x128xf32>, vector<1x128xf32>, vector<1x128xf32>, vector<1x128xf32>, vector<1x128xf32>, vector<1x128xf32> -> vector<8x128xf32>
    %c0_i32_16 = arith.constant 0 : i32
    %48 = arith.cmpi eq, %arg1, %c0_i32_16 : i32
    %49 = arith.extui %48 : i1 to i32
    %c0_i32_17 = arith.constant 0 : i32
    %50 = arith.cmpi ne, %49, %c0_i32_17 : i32
    scf.if %50 {
      %cst_24 = arith.constant 0.000000e+00 : f32
      %57 = vector.broadcast %cst_24 : f32 to vector<8x128xf32>
      %c0_25 = arith.constant 0 : index
      %c0_26 = arith.constant 0 : index
      %c0_27 = arith.constant 0 : index
      %58 = vector.load %arg5[%c0_25, %c0_26, %c0_27] : memref<1x8x128xf32, #tpu.memory_space<vmem>>, vector<1x8x128xf32>
      %59 = vector.shape_cast %58 : vector<1x8x128xf32> to vector<8x128xf32>
      %60 = vector.shape_cast %57 : vector<8x128xf32> to vector<1x8x128xf32>
      tpu.vector_store %arg5[%c0_25, %c0_26, %c0_27], %60 {strides = array<i32>} : memref<1x8x128xf32, #tpu.memory_space<vmem>>, vector<1x8x128xf32>,
    } else {
    }
    %c0_18 = arith.constant 0 : index
    %c0_19 = arith.constant 0 : index
    %c0_20 = arith.constant 0 : index
    %51 = vector.load %arg5[%c0_18, %c0_19, %c0_20] : memref<1x8x128xf32, #tpu.memory_space<vmem>>, vector<1x8x128xf32>
    %52 = vector.shape_cast %51 : vector<1x8x128xf32> to vector<8x128xf32>
    %53 = arith.addf %52, %47 : vector<8x128xf32>
    %c0_21 = arith.constant 0 : index
    %c0_22 = arith.constant 0 : index
    %c0_23 = arith.constant 0 : index
    %54 = vector.load %arg5[%c0_21, %c0_22, %c0_23] : memref<1x8x128xf32, #tpu.memory_space<vmem>>, vector<1x8x128xf32>
    %55 = vector.shape_cast %54 : vector<1x8x128xf32> to vector<8x128xf32>
    %56 = vector.shape_cast %53 : vector<8x128xf32> to vector<1x8x128xf32>
    tpu.vector_store %arg5[%c0_21, %c0_22, %c0_23], %56 {strides = array<i32>} : memref<1x8x128xf32, #tpu.memory_space<vmem>>, vector<1x8x128xf32>,
    return
  }
  func.func @transform_0(%arg0: i32, %arg1: i32) -> (i32, i32) {
    %c1_i32 = arith.constant 1 : i32
    %0 = arith.muli %arg0, %c1_i32 : i32
    %1 = arith.addi %0, %arg1 : i32
    %c0_i32 = arith.constant 0 : i32
    %c0_i32_0 = arith.constant 0 : i32
    return %1, %c0_i32 : i32, i32
  }
  func.func @transform_1(%arg0: i32, %arg1: i32) -> (i32, i32) {
    %c1_i32 = arith.constant 1 : i32
    %0 = arith.muli %arg0, %c1_i32 : i32
    %1 = arith.addi %0, %arg1 : i32
    %c0_i32 = arith.constant 0 : i32
    %c0_i32_0 = arith.constant 0 : i32
    return %1, %c0_i32 : i32, i32
  }
  func.func @transform_2(%arg0: i32, %arg1: i32) -> (i32, i32) {
    %c1_i32 = arith.constant 1 : i32
    %0 = arith.muli %arg0, %c1_i32 : i32
    %1 = arith.addi %0, %arg1 : i32
    %c0_i32 = arith.constant 0 : i32
    %c0_i32_0 = arith.constant 0 : i32
    return %1, %c0_i32 : i32, i32
  }
  func.func @transform_3(%arg0: i32, %arg1: i32) -> (i32, i32, i32) {
    %c0_i32 = arith.constant 0 : i32
    %c0_i32_0 = arith.constant 0 : i32
    %c0_i32_1 = arith.constant 0 : i32
    return %arg0, %c0_i32, %c0_i32_0 : i32, i32, i32
  }
}

module attributes {stable_mosaic.version = 11 : i64} {
  func.func @_corr_kernel(%arg0: i32, %arg1: i32, %arg2: i32, %arg3: memref<8x128xf32, #tpu.memory_space<vmem>>, %arg4: memref<128x8xf32, #tpu.memory_space<vmem>>, %arg5: memref<128x8xf32, #tpu.memory_space<vmem>>, %arg6: memref<8x128xf32, #tpu.memory_space<vmem>>, %arg7: memref<1x1x8x128xf32, #tpu.memory_space<vmem>>, %arg8: memref<128x128xf32, #tpu.memory_space<vmem>>) attributes {dimension_semantics = [#tpu.dimension_semantics<parallel>, #tpu.dimension_semantics<parallel>, #tpu.dimension_semantics<arbitrary>], iteration_bounds = array<i64: 1, 1, 1>, scalar_prefetch = 0 : i64, scratch_operands = 1 : i64, tpu.core_type = #tpu.core_type<tc>, window_params = [{pipeline_mode = #tpu.pipeline_mode<synchronous>, transform_indices = @transform_0, window_bounds = array<i64: 8, 128>}, {pipeline_mode = #tpu.pipeline_mode<synchronous>, transform_indices = @transform_1, window_bounds = array<i64: 128, 8>}, {transform_indices = @transform_2, window_bounds = array<i64: 128, 8>}, {transform_indices = @transform_3, window_bounds = array<i64: 8, 128>}, {transform_indices = @transform_4, window_bounds = array<i64: 1, 1, 8, 128>}]} {
    %c0_i32 = arith.constant 0 : i32
    %0 = arith.cmpi eq, %arg2, %c0_i32 : i32
    %1 = arith.extui %0 : i1 to i32
    %c0_i32_0 = arith.constant 0 : i32
    %2 = arith.cmpi ne, %1, %c0_i32_0 : i32
    scf.if %2 {
      %cst_10 = arith.constant 0.000000e+00 : f32
      %12 = vector.broadcast %cst_10 : f32 to vector<128x128xf32>
      %c0_11 = arith.constant 0 : index
      %c0_12 = arith.constant 0 : index
      %13 = vector.load %arg8[%c0_11, %c0_12] : memref<128x128xf32, #tpu.memory_space<vmem>>, vector<128x128xf32>
      tpu.vector_store %arg8[%c0_11, %c0_12], %12 {strides = array<i32>} : memref<128x128xf32, #tpu.memory_space<vmem>>, vector<128x128xf32>,
    } else {
    }
    %c0 = arith.constant 0 : index
    %c0_1 = arith.constant 0 : index
    %3 = vector.load %arg8[%c0, %c0_1] : memref<128x128xf32, #tpu.memory_space<vmem>>, vector<128x128xf32>
    %c0_2 = arith.constant 0 : index
    %c0_3 = arith.constant 0 : index
    %4 = vector.load %arg5[%c0_2, %c0_3] : memref<128x8xf32, #tpu.memory_space<vmem>>, vector<128x8xf32>
    %c0_4 = arith.constant 0 : index
    %c0_5 = arith.constant 0 : index
    %5 = vector.load %arg6[%c0_4, %c0_5] : memref<8x128xf32, #tpu.memory_space<vmem>>, vector<8x128xf32>
    %cst = arith.constant dense<0.000000e+00> : vector<128x128xf32>
    %6 = tpu.matmul %4, %5, %cst {dimension_numbers = #tpu.dot_dimension_numbers<[1], [0], [0], [1], [0, 0, 1, 1], [], []>} : vector<128x8xf32>, vector<8x128xf32>, vector<128x128xf32> -> vector<128x128xf32>
    %7 = arith.addf %3, %6 : vector<128x128xf32>
    %c0_6 = arith.constant 0 : index
    %c0_7 = arith.constant 0 : index
    %8 = vector.load %arg8[%c0_6, %c0_7] : memref<128x128xf32, #tpu.memory_space<vmem>>, vector<128x128xf32>
    tpu.vector_store %arg8[%c0_6, %c0_7], %7 {strides = array<i32>} : memref<128x128xf32, #tpu.memory_space<vmem>>, vector<128x128xf32>,
    %c0_i32_8 = arith.constant 0 : i32
    %9 = arith.cmpi eq, %arg2, %c0_i32_8 : i32
    %10 = arith.extui %9 : i1 to i32
    %c0_i32_9 = arith.constant 0 : i32
    %11 = arith.cmpi ne, %10, %c0_i32_9 : i32
    scf.if %11 {
      %c128_i32 = arith.constant 128 : i32
      %12 = arith.muli %arg1, %c128_i32 : i32
      %13 = tpu.assume_multiple %12, 128 : i32
      %c128_i32_10 = arith.constant 128 : i32
      %14 = arith.muli %arg0, %c128_i32_10 : i32
      %15 = tpu.assume_multiple %14, 8 : i32
      %c2 = arith.constant 2 : index
      %16 = arith.index_cast %13 : i32 to index
      %17 = vector.load %arg3[%c2, %16] : memref<8x128xf32, #tpu.memory_space<vmem>>, vector<1x128xf32>
      %c3 = arith.constant 3 : index
      %18 = arith.index_cast %13 : i32 to index
      %19 = vector.load %arg3[%c3, %18] : memref<8x128xf32, #tpu.memory_space<vmem>>, vector<1x128xf32>
      %20 = arith.index_cast %15 : i32 to index
      %c0_11 = arith.constant 0 : index
      %21 = vector.load %arg4[%20, %c0_11] : memref<128x8xf32, #tpu.memory_space<vmem>>, vector<128x1xf32>
      %22 = arith.index_cast %15 : i32 to index
      %c1 = arith.constant 1 : index
      %23 = vector.load %arg4[%22, %c1] : memref<128x8xf32, #tpu.memory_space<vmem>>, vector<128x1xf32>
      %c0_12 = arith.constant 0 : index
      %c0_13 = arith.constant 0 : index
      %24 = vector.load %arg8[%c0_12, %c0_13] : memref<128x128xf32, #tpu.memory_space<vmem>>, vector<128x128xf32>
      %cst_14 = arith.constant 1.250000e-01 : f32
      %25 = vector.broadcast %cst_14 : f32 to vector<128x128xf32>
      %26 = arith.mulf %24, %25 : vector<128x128xf32>
      %27 = vector.broadcast %21 : vector<128x1xf32> to vector<128x128xf32>
      %28 = vector.broadcast %17 : vector<1x128xf32> to vector<128x128xf32>
      %29 = arith.mulf %27, %28 : vector<128x128xf32>
      %30 = arith.subf %26, %29 : vector<128x128xf32>
      %31 = vector.broadcast %23 : vector<128x1xf32> to vector<128x128xf32>
      %32 = vector.broadcast %19 : vector<1x128xf32> to vector<128x128xf32>
      %33 = arith.mulf %31, %32 : vector<128x128xf32>
      %34 = arith.mulf %30, %33 : vector<128x128xf32>
      %35 = arith.mulf %34, %34 : vector<128x128xf32>
      %36 = vector.shape_cast %35 : vector<128x128xf32> to vector<1x128x128xf32>
      %cst_15 = arith.constant dense<0.000000e+00> : vector<1xf32>
      %37 = vector.multi_reduction <add>, %36, %cst_15 [1, 2] : vector<1x128x128xf32> to vector<1xf32>
      %38 = vector.shape_cast %37 : vector<1xf32> to vector<1x1x1xf32>
      %39 = vector.extract %38[0, 0, 0] : f32 from vector<1x1x1xf32>
      %40 = tpu.iota {dimensions = array<i32: 0>} : vector<128x128xi32>
      %41 = tpu.iota {dimensions = array<i32: 1>} : vector<128x128xi32>
      %42 = arith.cmpi eq, %40, %41 : vector<128x128xi32>
      %c128_i32_16 = arith.constant 128 : i32
      %43 = arith.muli %arg0, %c128_i32_16 : i32
      %44 = vector.broadcast %43 : i32 to vector<128x128xi32>
      %45 = arith.addi %44, %40 : vector<128x128xi32>
      %c32_i32 = arith.constant 32 : i32
      %46 = vector.broadcast %c32_i32 : i32 to vector<128x128xi32>
      %47 = arith.cmpi slt, %45, %46 : vector<128x128xi32>
      %48 = arith.andi %42, %47 : vector<128x128xi1>
      %49 = arith.cmpi eq, %arg0, %arg1 : i32
      %50 = vector.broadcast %49 : i1 to vector<128x128xi1>
      %51 = arith.andi %48, %50 : vector<128x128xi1>
      %cst_17 = arith.constant 0.000000e+00 : f32
      %52 = vector.broadcast %cst_17 : f32 to vector<128x128xf32>
      %53 = arith.select %51, %34, %52 : vector<128x128xi1>, vector<128x128xf32>
      %cst_18 = arith.constant 1.000000e+00 : f32
      %54 = vector.broadcast %cst_18 : f32 to vector<128x128xf32>
      %55 = arith.subf %34, %54 : vector<128x128xf32>
      %56 = arith.mulf %55, %55 : vector<128x128xf32>
      %cst_19 = arith.constant 0.000000e+00 : f32
      %57 = vector.broadcast %cst_19 : f32 to vector<128x128xf32>
      %58 = arith.select %51, %56, %57 : vector<128x128xi1>, vector<128x128xf32>
      %59 = vector.shape_cast %58 : vector<128x128xf32> to vector<1x128x128xf32>
      %cst_20 = arith.constant dense<0.000000e+00> : vector<1xf32>
      %60 = vector.multi_reduction <add>, %59, %cst_20 [1, 2] : vector<1x128x128xf32> to vector<1xf32>
      %61 = vector.shape_cast %60 : vector<1xf32> to vector<1x1x1xf32>
      %62 = vector.extract %61[0, 0, 0] : f32 from vector<1x1x1xf32>
      %63 = arith.mulf %53, %53 : vector<128x128xf32>
      %64 = vector.shape_cast %63 : vector<128x128xf32> to vector<1x128x128xf32>
      %cst_21 = arith.constant dense<0.000000e+00> : vector<1xf32>
      %65 = vector.multi_reduction <add>, %64, %cst_21 [1, 2] : vector<1x128x128xf32> to vector<1xf32>
      %66 = vector.shape_cast %65 : vector<1xf32> to vector<1x1x1xf32>
      %67 = vector.extract %66[0, 0, 0] : f32 from vector<1x1x1xf32>
      %68 = arith.subf %39, %67 : f32
      %69 = tpu.iota {dimensions = array<i32: 0>} : vector<8x128xi32>
      %70 = tpu.iota {dimensions = array<i32: 1>} : vector<8x128xi32>
      %c0_i32_22 = arith.constant 0 : i32
      %71 = vector.broadcast %c0_i32_22 : i32 to vector<8x128xi32>
      %72 = arith.cmpi eq, %69, %71 : vector<8x128xi32>
      %c0_i32_23 = arith.constant 0 : i32
      %73 = vector.broadcast %c0_i32_23 : i32 to vector<8x128xi32>
      %74 = arith.cmpi eq, %70, %73 : vector<8x128xi32>
      %75 = arith.andi %72, %74 : vector<8x128xi1>
      %c0_i32_24 = arith.constant 0 : i32
      %76 = vector.broadcast %c0_i32_24 : i32 to vector<8x128xi32>
      %77 = arith.cmpi eq, %69, %76 : vector<8x128xi32>
      %c1_i32 = arith.constant 1 : i32
      %78 = vector.broadcast %c1_i32 : i32 to vector<8x128xi32>
      %79 = arith.cmpi eq, %70, %78 : vector<8x128xi32>
      %80 = arith.andi %77, %79 : vector<8x128xi1>
      %cst_25 = arith.constant 0.000000e+00 : f32
      %81 = vector.broadcast %62 : f32 to vector<8x128xf32>
      %82 = vector.broadcast %cst_25 : f32 to vector<8x128xf32>
      %83 = arith.select %80, %81, %82 : vector<8x128xi1>, vector<8x128xf32>
      %84 = vector.broadcast %68 : f32 to vector<8x128xf32>
      %85 = arith.select %75, %84, %83 : vector<8x128xi1>, vector<8x128xf32>
      %c0_26 = arith.constant 0 : index
      %c0_27 = arith.constant 0 : index
      %c0_28 = arith.constant 0 : index
      %c0_29 = arith.constant 0 : index
      %86 = vector.load %arg7[%c0_26, %c0_27, %c0_28, %c0_29] : memref<1x1x8x128xf32, #tpu.memory_space<vmem>>, vector<1x1x8x128xf32>
      %87 = vector.shape_cast %86 : vector<1x1x8x128xf32> to vector<8x128xf32>
      %88 = vector.shape_cast %85 : vector<8x128xf32> to vector<1x1x8x128xf32>
      tpu.vector_store %arg7[%c0_26, %c0_27, %c0_28, %c0_29], %88 {strides = array<i32>} : memref<1x1x8x128xf32, #tpu.memory_space<vmem>>, vector<1x1x8x128xf32>,
    } else {
    }
    return
  }
  func.func @transform_0(%arg0: i32, %arg1: i32, %arg2: i32) -> (i32, i32) {
    %c0_i32 = arith.constant 0 : i32
    %c0_i32_0 = arith.constant 0 : i32
    %c0_i32_1 = arith.constant 0 : i32
    return %c0_i32, %c0_i32_0 : i32, i32
  }
  func.func @transform_1(%arg0: i32, %arg1: i32, %arg2: i32) -> (i32, i32) {
    %c0_i32 = arith.constant 0 : i32
    %c0_i32_0 = arith.constant 0 : i32
    %c0_i32_1 = arith.constant 0 : i32
    return %c0_i32, %c0_i32_0 : i32, i32
  }
  func.func @transform_2(%arg0: i32, %arg1: i32, %arg2: i32) -> (i32, i32) {
    %c0_i32 = arith.constant 0 : i32
    return %arg0, %arg2 : i32, i32
  }
  func.func @transform_3(%arg0: i32, %arg1: i32, %arg2: i32) -> (i32, i32) {
    %c0_i32 = arith.constant 0 : i32
    return %arg2, %arg1 : i32, i32
  }
  func.func @transform_4(%arg0: i32, %arg1: i32, %arg2: i32) -> (i32, i32, i32, i32) {
    %c0_i32 = arith.constant 0 : i32
    %c0_i32_0 = arith.constant 0 : i32
    %c0_i32_1 = arith.constant 0 : i32
    return %arg0, %arg1, %c0_i32, %c0_i32_0 : i32, i32, i32, i32
  }
}

</mosaic_0001>

<bundles_post_ra>
// kernel: bt_simclr_head.2
= control target key start
LH: loop header
LB: loop body
LE: loop exit
PB: predicated region body
PF: predicated region fallthrough
CT: control target
= control target key end

     0   :  { %vm114_vm0 = vcmask 7168   ;;  %v125_v44 = vlaneseq  ;;  %vm130_vm1 = vcmask 1040384   ;;  %vm132_vm2 = vcmask 1041408   ;;  %s213_s2 = inlined_call_operand.vmem [shape: f32[8,128], index: 2, kind: input, shape index: {}]   ;;  %s214_s0 = inlined_call_operand.vmem [shape: f32[8,128], index: 0, kind: input, shape index: {}]   ;;  %s215_s1 = inlined_call_operand.vmem [shape: f32[8,128], index: 1, kind: input, shape index: {}]   ;;  %s216_s3 = inlined_call_operand.vmem [shape: f32[1,8,128], index: 3, kind: output, shape index: {}]  }
   0x1   :  { %v93_v0 = vld [vmem:[%s213_s2] sm:$0xff]  ;;  %vm134_vm3 = vcmask 1042432   ;;  %vm136_vm5 = vcmask 1043456   ;;  %vm138_vm6 = vcmask 1044480   ;;  %vm140_vm7 = vcmask 1045504  }
   0x2   :  { %v94_v1 = vmul.f32 10.0, %v93_v0  ;;  %v65_v19 = vld [vmem:[%s214_s0] sm:$0xff]  ;;  %v126_v48 = vand.u32 127, %v125_v44  ;;  %vm142_vm8 = vcmask 1046528  }
   0x3   :  { %v73_v20 = vmul.f32 %v65_v19, %v65_v19  ;;  %v66_v21 = vld [vmem:[%s215_s1] sm:$0xff]  ;;  %v67_v22 = vrot.slane %v65_v19, 4 }
   0x4   :  { %95 = vmax.xlane.f32.xlu0 %v94_v1  ;;  %v86_v24 = vmul.f32 %v66_v21, %v66_v21  ;;  %v80_v25 = vrot.slane %v66_v21, 4  ;;  %vm127_vm4 = vcmp.eq.s32.totalorder %v126_v48, 0 }
   0x5   :  { %v74_v23 = vrot.slane %v73_v20, 4  ;;  %v68_v26 = vadd.f32 %v67_v22, %v65_v19 }
   0x6   :  { %v87_v28 = vrot.slane %v86_v24, 4  ;;  %v81_v29 = vadd.f32 %v80_v25, %v66_v21 }
   0x7   :  { %v75_v27 = vadd.f32 %v74_v23, %v73_v20  ;;  %v69_v30 = vrot.slane %v68_v26, 2 }
   0x8   :  { %v88_v32 = vadd.f32 %v87_v28, %v86_v24  ;;  %v82_v33 = vrot.slane %v81_v29, 2 }
   0x9   :  { %v76_v31 = vrot.slane %v75_v27, 2  ;;  %v70_v34 = vadd.f32 %v69_v30, %v68_v26 }
   0xa   :  { %v89_v36 = vrot.slane %v88_v32, 2  ;;  %v83_v37 = vadd.f32 %v82_v33, %v81_v29 }
   0xb   :  { %v77_v35 = vadd.f32 %v76_v31, %v75_v27  ;;  %v71_v38 = vrot.slane %v70_v34, 1 }
   0xc   :  { %v90_v40 = vadd.f32 %v89_v36, %v88_v32  ;;  %v84_v41 = vrot.slane %v83_v37, 1 }
   0xd   :  { %v78_v39 = vrot.slane %v77_v35, 1  ;;  %v72_v42 = vadd.f32 %v71_v38, %v70_v34 }
   0xe   :  { %v91_v45 = vrot.slane %v90_v40, 1  ;;  %v85_v46 = vadd.f32 %v84_v41, %v83_v37 }
   0xf   :  { %v79_v43 = vadd.f32 %v78_v39, %v77_v35 }
  0x10   :  { %v92_v49 = vadd.f32 %v91_v45, %v90_v40 }
  0x11   :  { %v131_v47 = vsel %vm130_vm1, %v72_v42, %v79_v43 }
  0x12   :  { %v133_v50 = vsel %vm132_vm2, %v131_v47, %v85_v46 }
  0x13   :  { %v135_v51 = vsel %vm134_vm3, %v133_v50, %v92_v49 }
  0x91   :  { %v96_v2 = vpop.xlane.xlu0 %95 }
  0x92   :  { %v97_v3 = vsub.f32 %v94_v1, %v96_v2 }
  0x94   :  { %v98_v4 = vmul.f32 1.442695, %v97_v3 }
  0x96   :  { %177 = vpow2.f32 %v98_v4 }
  0xa0   :  { %v178_v5 = vpop.eup %177 }
  0xa1   :  { %100 = vadd.xlane.f32.xlu0 %v178_v5 }
 0x12e   :  { %v101_v6 = vpop.xlane.xlu0 %100 }
 0x12f   :  { %179 = vlog2.f32 %v101_v6 }
 0x139   :  { %v180_v7 = vpop.eup %179 }
 0x13a   :  { %v103_v8 = vmul.f32 0.6931472, %v180_v7 }
 0x13c   :  { %v104_v9 = vadd.f32 %v103_v8, %v96_v2 }
 0x13e   :  { %v105_v10 = vsub.f32 %v104_v9, %v94_v1 }
 0x140   :  { %v115_v11 = vsel %vm114_vm0, %v105_v10, 0.0 }
 0x141   :  { %116 = vadd.xlane.f32.xlu1 %v115_v11 }
 0x1ce   :  { %v117_v12 = vpop.xlane.xlu1 %116 }
 0x1cf   :  { %v118_v13 = vrot.slane %v117_v12, 4 }
 0x1d1   :  { %v119_v14 = vadd.f32 %v118_v13, %v117_v12 }
 0x1d3   :  { %v120_v15 = vrot.slane %v119_v14, 2 }
 0x1d5   :  { %v121_v16 = vadd.f32 %v120_v15, %v119_v14 }
 0x1d7   :  { %v122_v17 = vrot.slane %v121_v16, 1 }
 0x1d9   :  { %v123_v18 = vadd.f32 %v122_v17, %v121_v16 }
 0x1db   :  { %174 = vpush %v123_v18 }
 0x20c   :  { %s175_s0 = spop %174 }
 0x20d   :  { %v128_v52 = vstv %s175_s0 }
 0x20e   :  { %v129_v53 = vsel %vm127_vm4, %v128_v52, 0.0 }
 0x20f   :  { %v137_v54 = vsel %vm136_vm5, %v135_v51, %v129_v53 }
 0x210   :  { %v139_v55 = vsel %vm138_vm6, %v137_v54, 0.0 }
 0x211   :  { %v141_v56 = vsel %vm140_vm7, %v139_v55, 0.0 }
 0x212   :  { %v143_v57 = vsel %vm142_vm8, %v141_v56, 0.0 }
 0x213   :  { %151 = vst [vmem:[%s216_s3] sm:$0xff] %v143_v57 }

// kernel: bt_simclr_head.3
= control target key start
LH: loop header
LB: loop body
LE: loop exit
PB: predicated region body
PF: predicated region fallthrough
CT: control target
= control target key end

     0   :  { %vm70_vm0 = vcmask 64512   ;;  %v962_v3 = vmov 0   ;;  %v963_v19 = vmov 1   ;;  %v611_v58 = vlaneseq  ;;  %s1291_s3 = inlined_call_operand.vmem [shape: f32[8,128], index: 3, kind: input, shape index: {}]   ;;  %s1292_s2 = inlined_call_operand.vmem [shape: f32[128,8], index: 2, kind: input, shape index: {}]   ;;  %s1293_s1 = inlined_call_operand.vmem [shape: f32[128,8], index: 1, kind: input, shape index: {}]   ;;  %s1294_s0 = inlined_call_operand.vmem [shape: f32[8,128], index: 0, kind: input, shape index: {}]   ;;  %s1295_s4 = inlined_call_operand.vmem [shape: f32[1,1,8,128], index: 4, kind: output, shape index: {}]  }
   0x1   :  { %v69_v0 = vld [vmem:[%s1291_s3] sm:$0xff]  ;;  %947 = vset.pattern.permute.xlu1 %v962_v3  ;;  %946 = vset.pattern.permute.xlu0 %v962_v3  ;;  %v54_v4 = vld [vmem:[%s1292_s2 + $0x8] sm:$0xff]  ;;  %v55_v6 = vld [vmem:[%s1292_s2 + $0x10] sm:$0xff] }
   0x2   :  { %v53_v1 = vld [vmem:[%s1292_s2] sm:$0xff]  ;;  %910 = vmatprep.subr.mxu0 %v69_v0  ;;  %936 = vmatprep.subr.mxu1 %v69_v0  ;;  %v62_v5 = vld [vmem:[%s1292_s2 + $0x48] sm:$0xff]  ;;  %v63_v7 = vld [vmem:[%s1292_s2 + $0x50] sm:$0xff]  ;;  %v1130_v61 = vshrl.u32 %v611_v58, 7 }
   0x3   :  { %v61_v2 = vld [vmem:[%s1292_s2 + $0x40] sm:$0xff]  ;;  %911 = vmatpush3.msra.mxu0 %v69_v0  ;;  %937 = vmatpush3.msra.mxu1 %v69_v0  ;;  %v56_v8 = vld [vmem:[%s1292_s2 + $0x18] sm:$0xff]  ;;  %v309_v10 = vld [vmem:[%s1293_s1 + $0x10] sm:$0xff] }
   0x4   :  { %912 = vmatprep.mubr.msk.f32.mxu0 %vm70_vm0, %v53_v1  ;;  %924 = vmatprep.mubr.msk.f32.mxu1 %vm70_vm0, %v61_v2  ;;  %v64_v9 = vld [vmem:[%s1292_s2 + $0x58] sm:$0xff]  ;;  %v57_v11 = vld [vmem:[%s1292_s2 + $0x20] sm:$0xff]  ;;  %v308_v14 = vld [vmem:[%s1293_s1 + $0x8] sm:$0xff]  ;;  %v1145_v2 = vadd.s32 8, %v1130_v61  ;;  %vm844_vm5 = vcmp.eq.s32.totalorder %v1130_v61, 0 }
   0x5   :  { %913 = vmatmul.mubr.msk.f32.vlgmr.msra.gmra.mrb[0].mxu0 %vm70_vm0, %v54_v4  ;;  %925 = vmatmul.mubr.msk.f32.vlgmr.msra.gmra.mrb[0].mxu1 %vm70_vm0, %v62_v5  ;;  %v65_v12 = vld [vmem:[%s1292_s2 + $0x60] sm:$0xff]  ;;  %v58_v15 = vld [vmem:[%s1292_s2 + $0x28] sm:$0xff]  ;;  %v59_v17 = vld [vmem:[%s1292_s2 + $0x30] sm:$0xff]  ;;  %v1151_v4 = vadd.s32 24, %v1130_v61  ;;  %v1153_v5 = vand.u32 127, %v611_v58 }
   0x6   :  { %915 = vmatprep.mubr.msk.f32.mxu0 %vm70_vm0, %v55_v6  ;;  %927 = vmatprep.mubr.msk.f32.mxu1 %vm70_vm0, %v63_v7  ;;  %v307_v13 = vld [vmem:[%s1293_s1] sm:$0xff]  ;;  %v66_v16 = vld [vmem:[%s1292_s2 + $0x68] sm:$0xff]  ;;  %v67_v18 = vld [vmem:[%s1292_s2 + $0x70] sm:$0xff] }
   0x7   :  { %367 = vperm.xlu1 %947, %v309_v10   ;;  %357 = vperm.xlu0 %946, %v307_v13   ;;  %v60_v20 = vld [vmem:[%s1292_s2 + $0x38] sm:$0xff]  ;;  %v311_v23 = vld [vmem:[%s1293_s1 + $0x20] sm:$0xff]  ;;  %v317_v25 = vld [vmem:[%s1293_s1 + $0x50] sm:$0xff]  ;;  %vm630_vm1 = vcmp.eq.s32.totalorder %v1130_v61, %v1153_v5  ;;  %vm631_vm2 = vcmp.eq.s32.totalorder %v1145_v2, %v1153_v5  ;;  %vm633_vm4 = vcmp.eq.s32.totalorder %v1151_v4, %v1153_v5  ;;  %vm847_vm6 = vcmp.eq.s32.totalorder %v1153_v5, 1 }
   0x8   :  { %v68_v21 = vld [vmem:[%s1292_s2 + $0x78] sm:$0xff]  ;;  %v312_v26 = vld [vmem:[%s1293_s1 + $0x28] sm:$0xff]  ;;  %v313_v27 = vld [vmem:[%s1293_s1 + $0x30] sm:$0xff]  ;;  %vm845_vm7 = vcmp.eq.s32.totalorder %v1153_v5, 0 }
   0x9   :  { %916 = vmatmul.mubr.msk.f32.gmra.mrb[2].mxu0 %vm70_vm0, %v56_v8  ;;  %928 = vmatmul.mubr.msk.f32.gmra.mrb[2].mxu1 %vm70_vm0, %v64_v9  ;;  %v310_v22 = vld [vmem:[%s1293_s1 + $0x18] sm:$0xff]  ;;  %v320_v28 = vld [vmem:[%s1293_s1 + $0x68] sm:$0xff]  ;;  %v315_v29 = vld [vmem:[%s1293_s1 + $0x40] sm:$0xff] }
   0xa   :  { %918 = vmatprep.mubr.msk.f32.mxu0 %vm70_vm0, %v57_v11  ;;  %930 = vmatprep.mubr.msk.f32.mxu1 %vm70_vm0, %v65_v12  ;;  %v314_v24 = vld [vmem:[%s1293_s1 + $0x38] sm:$0xff]  ;;  %v316_v30 = vld [vmem:[%s1293_s1 + $0x48] sm:$0xff]  ;;  %v319_v33 = vld [vmem:[%s1293_s1 + $0x60] sm:$0xff] }
   0xb   :  { %948 = vset.pattern.permute.xlu1 %v963_v19  ;;  %362 = vperm.xlu0 %946, %v308_v14   ;;  %v322_v31 = vld [vmem:[%s1293_s1 + $0x78] sm:$0xff]  ;;  %v321_v34 = vld [vmem:[%s1293_s1 + $0x70] sm:$0xff]  ;;  %v1135_v62 = vld [vmem:[%s1294_s0 + $0x2] ss:$0 sm:$0xff] }
   0xc   :  { %472 = vperm.xlu1 %948, %v307_v13   ;;  %v318_v32 = vld [vmem:[%s1293_s1 + $0x58] sm:$0xff]  ;;  %v1140_v63 = vld [vmem:[%s1294_s0 + $0x3] ss:$0 sm:$0xff]  ;;  %vm848_vm8 = vmand %vm844_vm5, %vm847_vm6 }
   0xd   :  { %919 = vmatmul.mubr.msk.f32.gmra.mrb[4].mxu0 %vm70_vm0, %v58_v15  ;;  %931 = vmatmul.mubr.msk.f32.gmra.mrb[4].mxu1 %vm70_vm0, %v66_v16  ;;  %vm846_vm9 = vmand %vm844_vm5, %vm845_vm7 }
   0xe   :  { %921 = vmatprep.mubr.msk.f32.mxu0 %vm70_vm0, %v59_v17  ;;  %933 = vmatprep.mubr.msk.f32.mxu1 %vm70_vm0, %v67_v18 }
   0xf   :  { %949 = vset.pattern.permute.xlu0 %v963_v19 }
  0x10   :  { %950 = vset.pattern.permute.xlu1 %v962_v3  ;;  %476 = vperm.xlu0 %949, %v308_v14  }
  0x11   :  { %922 = vmatmul.mubr.msk.f32.gmra.mrb[6].mxu0 %vm70_vm0, %v60_v20  ;;  %934 = vmatmul.mubr.msk.f32.gmra.mrb[6].mxu1 %vm70_vm0, %v68_v21 }
  0x12   :  { %372 = vperm.xlu1 %950, %v310_v22  }
  0x14   :  { %488 = vperm.xlu0 %949, %v311_v23  }
  0x16   :  { %951 = vset.pattern.permute.xlu1 %v963_v19 }
  0x17   :  { %480 = vperm.xlu1 %951, %v309_v10  }
  0x18   :  { %500 = vperm.xlu0 %949, %v314_v24  }
  0x1b   :  { %484 = vperm.xlu1 %951, %v310_v22  }
  0x1c   :  { %512 = vperm.xlu0 %949, %v317_v25  }
  0x1f   :  { %952 = vset.pattern.permute.xlu1 %v962_v3 }
  0x20   :  { %382 = vperm.xlu1 %952, %v312_v26   ;;  %957 = vset.pattern.permute.xlu0 %v962_v3 }
  0x21   :  { %377 = vperm.xlu0 %957, %v311_v23  }
  0x24   :  { %387 = vperm.xlu1 %952, %v313_v27  }
  0x25   :  { %392 = vperm.xlu0 %957, %v314_v24  }
  0x28   :  { %953 = vset.pattern.permute.xlu1 %v963_v19 }
  0x29   :  { %492 = vperm.xlu1 %953, %v312_v26   ;;  %407 = vperm.xlu0 %957, %v317_v25  }
  0x2d   :  { %496 = vperm.xlu1 %953, %v313_v27   ;;  %422 = vperm.xlu0 %957, %v320_v28  }
  0x31   :  { %954 = vset.pattern.permute.xlu1 %v962_v3  ;;  %960 = vset.pattern.permute.xlu0 %v963_v19 }
  0x32   :  { %397 = vperm.xlu1 %954, %v315_v29   ;;  %524 = vperm.xlu0 %960, %v320_v28  }
  0x36   :  { %402 = vperm.xlu1 %954, %v316_v30   ;;  %532 = vperm.xlu0 %960, %v322_v31  }
  0x3a   :  { %955 = vset.pattern.permute.xlu1 %v963_v19 }
  0x3b   :  { %504 = vperm.xlu1 %955, %v315_v29  }
  0x3f   :  { %508 = vperm.xlu1 %955, %v316_v30  }
  0x43   :  { %956 = vset.pattern.permute.xlu1 %v962_v3 }
  0x44   :  { %412 = vperm.xlu1 %956, %v318_v32  }
  0x48   :  { %417 = vperm.xlu1 %956, %v319_v33  }
  0x4c   :  { %958 = vset.pattern.permute.xlu1 %v963_v19 }
  0x4d   :  { %516 = vperm.xlu1 %958, %v318_v32  }
  0x51   :  { %520 = vperm.xlu1 %958, %v319_v33  }
  0x55   :  { %959 = vset.pattern.permute.xlu1 %v962_v3  ;;  %v1148_v3 = vadd.s32 16, %v1130_v61 }
  0x56   :  { %427 = vperm.xlu1 %959, %v321_v34  }
  0x57   :  { %vm632_vm3 = vcmp.eq.s32.totalorder %v1148_v3, %v1153_v5 }
  0x5a   :  { %432 = vperm.xlu1 %959, %v322_v31  }
  0x5e   :  { %961 = vset.pattern.permute.xlu1 %v963_v19 }
  0x5f   :  { %528 = vperm.xlu1 %961, %v321_v34  }
  0x86   :  { %v368_v35 = vpop.permute.xlu1 %367  ;;  %v358_v41 = vpop.permute.xlu0 %357 }
  0x87   :  { %v441_v6 = vmul.f32 %v1135_v62, %v368_v35  ;;  %v439_v8 = vmul.f32 %v1135_v62, %v358_v41 }
  0x8a   :  { %v363_v43 = vpop.permute.xlu0 %362 }
  0x8b   :  { %v473_v36 = vpop.permute.xlu1 %472  ;;  %v440_v9 = vmul.f32 %v1135_v62, %v363_v43 }
  0x8c   :  { %v539_v7 = vmul.f32 %v1140_v63, %v473_v36 }
  0x8f   :  { %v477_v45 = vpop.permute.xlu0 %476 }
  0x90   :  { %v540_v12 = vmul.f32 %v1140_v63, %v477_v45 }
  0x91   :  { %v373_v37 = vpop.permute.xlu1 %372 }
  0x92   :  { %v442_v10 = vmul.f32 %v1135_v62, %v373_v37 }
  0x93   :  { %v489_v48 = vpop.permute.xlu0 %488 }
  0x94   :  { %v1163_v13 = vmul.f32 %v1140_v63, %v489_v48 }
  0x96   :  { %v481_v38 = vpop.permute.xlu1 %480 }
  0x97   :  { %v501_v50 = vpop.permute.xlu0 %500  ;;  %v541_v11 = vmul.f32 %v1140_v63, %v481_v38 }
  0x98   :  { %v1167_v17 = vmul.f32 %v1140_v63, %v501_v50 }
  0x9a   :  { %v485_v39 = vpop.permute.xlu1 %484 }
  0x9b   :  { %v513_v52 = vpop.permute.xlu0 %512  ;;  %v542_v16 = vmul.f32 %v1140_v63, %v485_v39 }
  0x9c   :  { %v1170_v18 = vmul.f32 %v1140_v63, %v513_v52 }
  0x9f   :  { %v383_v40 = vpop.permute.xlu1 %382 }
  0xa0   :  { %v378_v54 = vpop.permute.xlu0 %377  ;;  %v444_v22 = vmul.f32 %v1135_v62, %v383_v40 }
  0xa1   :  { %v1177_v24 = vmul.f32 %v1135_v62, %v378_v54 }
  0xa3   :  { %v388_v42 = vpop.permute.xlu1 %387 }
  0xa4   :  { %v393_v56 = vpop.permute.xlu0 %392  ;;  %v1174_v23 = vmul.f32 %v1135_v62, %v388_v42 }
  0xa5   :  { %v1180_v26 = vmul.f32 %v1135_v62, %v393_v56 }
  0xa8   :  { %v493_v44 = vpop.permute.xlu1 %492  ;;  %v408_v59 = vpop.permute.xlu0 %407 }
  0xa9   :  { %v544_v32 = vmul.f32 %v1140_v63, %v493_v44  ;;  %v1187_v35 = vmul.f32 %v1135_v62, %v408_v59 }
  0xac   :  { %v497_v46 = vpop.permute.xlu1 %496  ;;  %v423_v0 = vpop.permute.xlu0 %422 }
  0xad   :  { %v1184_v33 = vmul.f32 %v1140_v63, %v497_v46  ;;  %v1196_v46 = vmul.f32 %v1135_v62, %v423_v0 }
  0xb1   :  { %v398_v47 = vpop.permute.xlu1 %397  ;;  %v525_v30 = vpop.permute.xlu0 %524 }
  0xb2   :  { %v447_v38 = vmul.f32 %v1135_v62, %v398_v47  ;;  %v1199_v48 = vmul.f32 %v1140_v63, %v525_v30 }
  0xb5   :  { %v403_v49 = vpop.permute.xlu1 %402 }
  0xb6   :  { %v448_v39 = vmul.f32 %v1135_v62, %v403_v49 }
  0xba   :  { %v1120_v51 = vpop.permute.xlu1 %504 }
  0xbb   :  { %v547_v54 = vmul.f32 %v1140_v63, %v1120_v51 }
  0xbe   :  { %v1122_v53 = vpop.permute.xlu1 %508 }
  0xbf   :  { %v548_v56 = vmul.f32 %v1140_v63, %v1122_v53 }
  0xc3   :  { %v1124_v55 = vpop.permute.xlu1 %412 }
  0xc7   :  { %v1126_v57 = vpop.permute.xlu1 %417 }
  0xcc   :  { %v1128_v60 = vpop.permute.xlu1 %516 }
  0xd0   :  { %v1142_v1 = vpop.permute.xlu1 %520 }
  0xd5   :  { %v428_v31 = vpop.permute.xlu1 %427 }
  0xd8   :  { %v914_v14 = vpop.f32.mrb[0].mxu0  ;;  %v926_v15 = vpop.f32.mrb[0].mxu1 }
  0xd9   :  { %v340_v19 = vmul.f32 0.125, %v914_v14  ;;  %v185_v20 = vpop.f32.mrb[1].mxu0  ;;  %v225_v21 = vpop.f32.mrb[1].mxu1  ;;  %v348_v28 = vmul.f32 0.125, %v926_v15 }
  0xda   :  { %v339_v25 = vmul.f32 0.125, %v185_v20  ;;  %v347_v29 = vmul.f32 0.125, %v225_v21 }
  0xdb   :  { %v456_v27 = vsub.f32 %v340_v19, %v440_v9  ;;  %v464_v47 = vsub.f32 %v348_v28, %v448_v39  ;;  %v1213_v9 = vmul.f32 %v1135_v62, %v1126_v57 }
  0xdc   :  { %v455_v34 = vsub.f32 %v339_v25, %v439_v8  ;;  %v917_v36 = vpop.f32.mrb[2].mxu0  ;;  %v929_v37 = vpop.f32.mrb[2].mxu1  ;;  %v463_v52 = vsub.f32 %v347_v29, %v447_v38  ;;  %v450_v8 = vmul.f32 %v1135_v62, %v1124_v55 }
  0xdd   :  { %v1191_v40 = vmul.f32 %v540_v12, %v456_v27  ;;  %v342_v41 = vmul.f32 0.125, %v917_v36  ;;  %v195_v42 = vpop.f32.mrb[3].mxu0  ;;  %v235_v43 = vpop.f32.mrb[3].mxu1  ;;  %v564_v20 = vmul.f32 %v548_v56, %v464_v47  ;;  %v350_v25 = vmul.f32 0.125, %v929_v37 }
  0xde   :  { %v1193_v45 = vmul.f32 %v539_v7, %v455_v34  ;;  %v341_v44 = vmul.f32 0.125, %v195_v42  ;;  %v563_v21 = vmul.f32 %v547_v54, %v463_v52  ;;  %v433_v55 = vpop.permute.xlu1 %432  ;;  %v349_v29 = vmul.f32 0.125, %v235_v43 }
  0xdf   :  { %v572_v50 = vmul.f32 %v1191_v40, %v1191_v40  ;;  %v458_v49 = vsub.f32 %v342_v41, %v442_v10  ;;  %v550_v10 = vmul.f32 %v1140_v63, %v1128_v60  ;;  %v1222_v60 = vmul.f32 %v1140_v63, %v1142_v1 }
  0xe0   :  { %v571_v58 = vmul.f32 %v1193_v45, %v1193_v45  ;;  %v457_v59 = vsub.f32 %v341_v44, %v441_v6  ;;  %v920_v0 = vpop.f32.mrb[4].mxu0  ;;  %v932_v7 = vpop.f32.mrb[4].mxu1  ;;  %v1234_v1 = vmul.f32 %v1135_v62, %v433_v55  ;;  %v580_v42 = vmul.f32 %v564_v20, %v564_v20 }
  0xe1   :  { %v344_v51 = vmul.f32 0.125, %v920_v0  ;;  %v205_v12 = vpop.f32.mrb[5].mxu0  ;;  %v245_v14 = vpop.f32.mrb[5].mxu1  ;;  %v1217_v15 = vmul.f32 %v542_v16, %v458_v49  ;;  %v579_v43 = vmul.f32 %v563_v21, %v563_v21  ;;  %v466_v44 = vsub.f32 %v350_v25, %v450_v8 }
  0xe2   :  { %v587_v53 = vadd.f32 %v572_v50, %v571_v58  ;;  %v557_v19 = vmul.f32 %v541_v11, %v457_v59  ;;  %v343_v6 = vmul.f32 0.125, %v205_v12  ;;  %v877_v49 = vadd.f32 -1.0, %v1193_v45 }
  0xe3   :  { %v460_v27 = vsub.f32 %v344_v51, %v444_v22  ;;  %v574_v37 = vmul.f32 %v1217_v15, %v1217_v15  ;;  %v880_v59 = vadd.f32 -1.0, %v1217_v15  ;;  %v352_v0 = vmul.f32 0.125, %v932_v7 }
  0xe4   :  { %v573_v28 = vmul.f32 %v557_v19, %v557_v19  ;;  %v459_v57 = vsub.f32 %v343_v6, %v1177_v24  ;;  %v923_v30 = vpop.f32.mrb[6].mxu0  ;;  %v935_v34 = vpop.f32.mrb[6].mxu1  ;;  %v1231_v24 = vmul.f32 %v1135_v62, %v428_v31  ;;  %v465_v31 = vsub.f32 %v349_v29, %v1187_v35 }
  0xe5   :  { %v560_v11 = vmul.f32 %v544_v32, %v460_v27  ;;  %v346_v16 = vmul.f32 0.125, %v923_v30  ;;  %v215_v22 = vpop.f32.mrb[7].mxu0  ;;  %v255_v36 = vpop.f32.mrb[7].mxu1  ;;  %v879_v54 = vadd.f32 -1.0, %v557_v19  ;;  %v747_v8 = vmul.f32 %v877_v49, %v877_v49 }
  0xe6   :  { %v559_v38 = vmul.f32 %v1163_v13, %v459_v57  ;;  %v588_v39 = vadd.f32 %v587_v53, %v573_v28  ;;  %v345_v41 = vmul.f32 0.125, %v215_v22  ;;  %v878_v13 = vadd.f32 -1.0, %v1191_v40 }
  0xe7   :  { %v462_v32 = vsub.f32 %v346_v16, %v1180_v26  ;;  %v576_v52 = vmul.f32 %v560_v11, %v560_v11  ;;  %v749_v51 = vmul.f32 %v879_v54, %v879_v54  ;;  %v566_v12 = vmul.f32 %v550_v10, %v466_v44  ;;  %v529_v16 = vpop.permute.xlu1 %528 }
  0xe8   :  { %v575_v62 = vmul.f32 %v559_v38, %v559_v38  ;;  %v589_v50 = vadd.f32 %v588_v39, %v574_v37  ;;  %v461_v47 = vsub.f32 %v345_v41, %v1174_v23  ;;  %v748_v35 = vmul.f32 %v878_v13, %v878_v13  ;;  %v533_v39 = vpop.permute.xlu0 %532 }
  0xe9   :  { %v562_v58 = vmul.f32 %v1167_v17, %v462_v32  ;;  %v351_v53 = vmul.f32 0.125, %v245_v14  ;;  %v750_v20 = vmul.f32 %v880_v59, %v880_v59  ;;  %v763_v21 = vsel %vm630_vm1, %v747_v8, 0.0 }
  0xea   :  { %v590_v56 = vadd.f32 %v589_v50, %v575_v62  ;;  %v561_v26 = vmul.f32 %v1184_v33, %v461_v47  ;;  %v764_v17 = vsel %vm631_vm2, %v748_v35, 0.0  ;;  %v765_v33 = vsel %vm632_vm3, %v749_v51, 0.0 }
  0xeb   :  { %v565_v7 = vmul.f32 %v1170_v18, %v465_v31  ;;  %v578_v25 = vmul.f32 %v562_v58, %v562_v58  ;;  %v779_v14 = vadd.f32 %v764_v17, %v763_v21  ;;  %v468_v27 = vsub.f32 %v352_v0, %v1196_v46 }
  0xec   :  { %v577_v23 = vmul.f32 %v561_v26, %v561_v26  ;;  %v591_v6 = vadd.f32 %v590_v56, %v576_v52  ;;  %v715_v55 = vsel %vm630_vm1, %v1193_v45, 0.0  ;;  %v716_v28 = vsel %vm631_vm2, %v1191_v40, 0.0 }
  0xed   :  { %v717_v29 = vsel %vm632_vm3, %v557_v19, 0.0  ;;  %v467_v18 = vsub.f32 %v351_v53, %v1213_v9  ;;  %v780_v30 = vadd.f32 %v779_v14, %v765_v33  ;;  %v353_v11 = vmul.f32 0.125, %v255_v36 }
  0xee   :  { %v592_v10 = vadd.f32 %v591_v6, %v577_v23  ;;  %v766_v46 = vsel %vm633_vm4, %v750_v20, 0.0  ;;  %v803_v45 = vmul.f32 %v715_v55, %v715_v55  ;;  %v804_v22 = vmul.f32 %v716_v28, %v716_v28 }
  0xef   :  { %v805_v37 = vmul.f32 %v717_v29, %v717_v29  ;;  %v354_v2 = vmul.f32 0.125, %v935_v34  ;;  %v781_v40 = vadd.f32 %v780_v30, %v766_v46  ;;  %v718_v3 = vsel %vm633_vm4, %v1217_v15, 0.0 }
  0xf0   :  { %v593_v57 = vadd.f32 %v592_v10, %v578_v25  ;;  %v581_v9 = vmul.f32 %v565_v7, %v565_v7  ;;  %v819_v19 = vadd.f32 %v804_v22, %v803_v45  ;;  %v567_v36 = vmul.f32 %v1222_v60, %v467_v18 }
  0xf1   :  { %794 = vadd.xlane.f32.xlu0 %v781_v40  ;;  %v469_v44 = vsub.f32 %v353_v11, %v1231_v24  ;;  %v553_v32 = vmul.f32 %v1140_v63, %v529_v16  ;;  %v806_v34 = vmul.f32 %v718_v3, %v718_v3  ;;  %v582_v62 = vmul.f32 %v566_v12, %v566_v12 }
  0xf2   :  { %v594_v38 = vadd.f32 %v593_v57, %v579_v43  ;;  %v554_v43 = vmul.f32 %v1140_v63, %v533_v39  ;;  %v820_v31 = vadd.f32 %v819_v19, %v805_v37  ;;  %v568_v50 = vmul.f32 %v1199_v48, %v468_v27 }
  0xf3   :  { %v470_v4 = vsub.f32 %v354_v2, %v1234_v1  ;;  %v583_v52 = vmul.f32 %v567_v36, %v567_v36  ;;  %v569_v49 = vmul.f32 %v553_v32, %v469_v44 }
  0xf4   :  { %v595_v41 = vadd.f32 %v594_v38, %v580_v42  ;;  %v821_v47 = vadd.f32 %v820_v31, %v806_v34  ;;  %v584_v42 = vmul.f32 %v568_v50, %v568_v50 }
  0xf5   :  { %v570_v13 = vmul.f32 %v554_v43, %v470_v4  ;;  %v585_v54 = vmul.f32 %v569_v49, %v569_v49 }
  0xf6   :  { %v596_v15 = vadd.f32 %v595_v41, %v581_v9  ;;  %834 = vadd.xlane.f32.xlu0 %v821_v47 }
  0xf7   :  { %v586_v58 = vmul.f32 %v570_v13, %v570_v13 }
  0xf8   :  { %v597_v60 = vadd.f32 %v596_v15, %v582_v62 }
  0xfa   :  { %v598_v24 = vadd.f32 %v597_v60, %v583_v52 }
  0xfc   :  { %v599_v56 = vadd.f32 %v598_v24, %v584_v42 }
  0xfe   :  { %v600_v63 = vadd.f32 %v599_v56, %v585_v54 }
 0x100   :  { %v601_v26 = vadd.f32 %v600_v63, %v586_v58 }
 0x102   :  { %602 = vadd.xlane.f32.xlu1 %v601_v26 }
 0x17e   :  { %v795_v59 = vpop.xlane.xlu0 %794 }
 0x17f   :  { %v796_v48 = vrot.slane %v795_v59, 4 }
 0x181   :  { %v797_v1 = vadd.f32 %v796_v48, %v795_v59 }
 0x183   :  { %v835_v0 = vpop.xlane.xlu0 %834  ;;  %v798_v51 = vrot.slane %v797_v1, 2 }
 0x184   :  { %v836_v8 = vrot.slane %v835_v0, 4 }
 0x185   :  { %v799_v20 = vadd.f32 %v798_v51, %v797_v1 }
 0x186   :  { %v837_v35 = vadd.f32 %v836_v8, %v835_v0 }
 0x187   :  { %v800_v7 = vrot.slane %v799_v20, 1 }
 0x188   :  { %v838_v53 = vrot.slane %v837_v35, 2 }
 0x189   :  { %v801_v27 = vadd.f32 %v800_v7, %v799_v20 }
 0x18a   :  { %v839_v21 = vadd.f32 %v838_v53, %v837_v35 }
 0x18c   :  { %v840_v10 = vrot.slane %v839_v21, 1 }
 0x18e   :  { %v841_v55 = vadd.f32 %v840_v10, %v839_v21 }
 0x18f   :  { %v603_v12 = vpop.xlane.xlu1 %602 }
 0x190   :  { %v604_v23 = vrot.slane %v603_v12, 4 }
 0x192   :  { %v605_v6 = vadd.f32 %v604_v23, %v603_v12 }
 0x194   :  { %v606_v17 = vrot.slane %v605_v6, 2 }
 0x196   :  { %v607_v33 = vadd.f32 %v606_v17, %v605_v6 }
 0x198   :  { %v608_v25 = vrot.slane %v607_v33, 1 }
 0x19a   :  { %v609_v14 = vadd.f32 %v608_v25, %v607_v33 }
 0x19c   :  { %938 = vpush %v609_v14 }
 0x19d   :  { %940 = vpush %v801_v27 }
 0x19e   :  { %942 = vpush %v841_v55 }
 0x1cd   :  { %s939_s0 = spop %938 }
 0x1ce   :  { %s941_s28 = spop %940 }
 0x1cf   :  { %v849_v28 = vstv %s941_s28  ;;  %s943_s29 = spop %942 }
 0x1d0   :  { %v850_v29 = vsel %vm848_vm8, %v849_v28, 0.0  ;;  %s843_s30 = ssub.f32 %s939_s0, %s943_s29 }
 0x1d2   :  { %v851_v18 = vstv %s843_s30 }
 0x1d3   :  { %v852_v57 = vsel %vm846_vm9, %v851_v18, %v850_v29 }
 0x1d4   :  { %853 = vst [vmem:[%s1295_s4] sm:$0xff] %v852_v57 }

</bundles_post_ra>
